<compile_context>
chip_gen: v7x
topology: tpu7x:2x2x1
jax: 0.10.0
libtpu: 0.0.40
codegen_flags: <defaults>
</compile_context>

<pallas_src>
import functools

import numpy as np
import jax
import jax.numpy as jnp
from jax.experimental import pallas as pl
from jax.experimental.pallas import tpu as pltpu


# ---------------------------------------------------------------------------
# Standard JPEG luminance quantization table (same values / .T as DiffJPEG).
# ---------------------------------------------------------------------------
_Y_TABLE_NP = np.array(
    [[16, 11, 10, 16, 24, 40, 51, 61],
     [12, 12, 14, 19, 26, 58, 60, 55],
     [14, 13, 16, 24, 40, 57, 69, 56],
     [14, 17, 22, 29, 51, 87, 80, 62],
     [18, 22, 37, 56, 68, 109, 103, 77],
     [24, 35, 55, 64, 81, 104, 113, 92],
     [49, 64, 78, 87, 103, 121, 120, 101],
     [72, 92, 95, 98, 112, 100, 103, 99]],
    dtype=np.float32).T

_LANES = 512  # lane-dense width: multiple of 128 and of 64 (one 8x8 block)
_Y_ROW_TILED = np.tile(_Y_TABLE_NP.reshape(-1), _LANES // 64).reshape(1, _LANES)


def _round_up(x: int, m: int) -> int:
    return ((x + m - 1) // m) * m


@functools.lru_cache(maxsize=None)
def _max_block_rows() -> int:
    """Per-generation row-tile cap.

    1024 rows (2 MiB f32 per tile; 8 MiB of double-buffered in+out) is safe
    under v5e's 16 MiB default scoped VMEM and near-roofline on v5e/v6e.
    v7x's ~3.2 TB/s per-TC HBM wants 2048-row tiles (16 MiB of buffers, still
    under its 32 MiB default scoped VMEM).  Detection is best-effort; any
    failure or ambiguity falls back to the everywhere-safe 1024.
    """
    try:
        info = pltpu.get_tpu_info()
        tag = " ".join(
            str(getattr(info, a, ""))
            for a in ("chip_version", "version", "name")).lower()
        if any(p in tag for p in ("v7", "7x", "tpu7", "tpu_7")):
            return 2048
    except Exception:
        pass
    return 1024


@functools.lru_cache(maxsize=None)
def _q_row_device(factor: float) -> jax.Array:
    # Pre-scaled, pre-tiled (1, 512) quantization row = 8 copies of the
    # flattened 8x8 table times `factor`.  Cached per factor so repeated
    # calls pay no host->device transfer.
    return jnp.asarray(_Y_ROW_TILED * np.float32(factor))


def _y_quantize_kernel(img_ref, q_ref, out_ref):
    # Pure streaming elementwise op.  q_ref is the pre-scaled (1, LANES) row
    # broadcast over the rows of the tile.  True divide is kept (not 1/q
    # multiply) for bit-exact parity with torch.round(image/(y_table*factor));
    # round is half-to-even in both frameworks.
    out_ref[...] = jnp.round(img_ref[...].astype(jnp.float32) / q_ref[...])


def y_quantize(image: jax.Array, factor: float = 1.0) -> jax.Array:
    """image: (..., 8, 8) any float/int dtype -> same shape, float32."""
    # TODO(synk): `factor` is baked in at trace time as a Python float; accept
    # it as an SMEM scalar instead if traced/dynamic factors are ever needed.
    assert image.shape[-2:] == (8, 8), "trailing dims must be 8x8 JPEG blocks"
    orig_shape = image.shape
    total = image.size

    # ---- lane-dense (rows, 512) view of the contiguous buffer -------------
    # The row dimension is left UNPADDED; the ragged final row-block is
    # handled by Pallas (OOB writes dropped; the op is purely elementwise so
    # nothing ever reads the junk lanes).  Only a sub-512 tail (number of 8x8
    # blocks not divisible by 8) needs a pad copy + output slice.
    rows = pl.cdiv(total, _LANES)
    tail = rows * _LANES - total

    flat = image.reshape(-1)          # keep native dtype; cast in-kernel
    if tail:
        flat = jnp.pad(flat, (0, tail))   # padded zeros -> round(0/q) = 0
    x2d = flat.reshape(rows, _LANES)

    max_rows = _max_block_rows()
    if rows >= max_rows:
        block_rows = max_rows
    elif rows >= 32:
        # Aim for >= 2 grid steps so ("parallel",) can shard across v7x's two
        # TensorCores; 32-row granularity keeps bf16/int8 sublane tiles whole.
        block_rows = min(max_rows, _round_up(pl.cdiv(rows, 2), 32))
    else:
        block_rows = rows             # single full-array block (== full dim)

    grid = (pl.cdiv(rows, block_rows),)

    out2d = pl.pallas_call(
        _y_quantize_kernel,
        out_shape=jax.ShapeDtypeStruct((rows, _LANES), jnp.float32),
        grid_spec=pltpu.PrefetchScalarGridSpec(
            num_scalar_prefetch=0,
            grid=grid,
            in_specs=[
                pl.BlockSpec((block_rows, _LANES), lambda i: (i, 0)),
                # tiny constant row; block index never changes -> fetched once
                pl.BlockSpec((1, _LANES), lambda i: (0, 0)),
            ],
            out_specs=pl.BlockSpec((block_rows, _LANES), lambda i: (i, 0)),
        ),
        compiler_params=pltpu.CompilerParams(
            dimension_semantics=("parallel",)),   # shards steps over v7x TCs
    )(x2d, _q_row_device(float(factor)))

    out = out2d.reshape(-1)
    if tail:
        out = out[:total]
    return out.reshape(orig_shape)


if __name__ == "__main__":
    table = jnp.asarray(_Y_TABLE_NP)

    # 16 DCT blocks of 8x8 (e.g. batch=2 images x 8 blocks) -> tiny path
    # (rows=2, single full block).
    x = jax.random.uniform(jax.random.PRNGKey(0), (16, 8, 8), jnp.float32,
                           minval=-128.0, maxval=127.0)
    out = jax.block_until_ready(y_quantize(x, 1.0))
    ref = jnp.round(x / (table * np.float32(1.0)))
    assert out.shape == x.shape and out.dtype == jnp.float32
    np.testing.assert_array_equal(np.asarray(out), np.asarray(ref))

    # Larger case exercising the ragged final row-block (rows=125, two grid
    # steps, NO whole-array pad/slice since total % 512 == 0).
    x2 = jax.random.uniform(jax.random.PRNGKey(1), (1000, 8, 8), jnp.float32,
                            minval=-128.0, maxval=127.0)
    out2 = jax.block_until_ready(y_quantize(x2, 2.0))
    ref2 = jnp.round(x2 / (table * np.float32(2.0)))
    np.testing.assert_array_equal(np.asarray(out2), np.asarray(ref2))

    # Number of 8x8 blocks not divisible by 8 -> sub-512 tail pad path.
    x3 = jax.random.uniform(jax.random.PRNGKey(2), (250, 8, 8), jnp.float32,
                            minval=-128.0, maxval=127.0)
    out3 = jax.block_until_ready(y_quantize(x3, 0.5))
    ref3 = jnp.round(x3 / (table * np.float32(0.5)))
    np.testing.assert_array_equal(np.asarray(out3), np.asarray(ref3))

    print("KERNEL_OK")
</pallas_src>

<mosaic_0001>
module attributes {stable_mosaic.version = 11 : i64} {
  func.func @_y_quantize_kernel(%arg0: i32, %arg1: memref<2x512xf32, #tpu.memory_space<vmem>>, %arg2: memref<1x512xf32, #tpu.memory_space<vmem>>, %arg3: memref<2x512xf32, #tpu.memory_space<vmem>>) attributes {dimension_semantics = [#tpu.dimension_semantics<parallel>], iteration_bounds = array<i64: 1>, scalar_prefetch = 0 : i64, scratch_operands = 0 : i64, tpu.core_type = #tpu.core_type<tc>, window_params = [{transform_indices = @transform_0, window_bounds = array<i64: 2, 512>}, {pipeline_mode = #tpu.pipeline_mode<synchronous>, transform_indices = @transform_1, window_bounds = array<i64: 1, 512>}, {transform_indices = @transform_2, window_bounds = array<i64: 2, 512>}]} {
    %c0 = arith.constant 0 : index
    %c0_0 = arith.constant 0 : index
    %0 = vector.load %arg1[%c0, %c0_0] : memref<2x512xf32, #tpu.memory_space<vmem>>, vector<2x512xf32>
    %c0_1 = arith.constant 0 : index
    %c0_2 = arith.constant 0 : index
    %1 = vector.load %arg2[%c0_1, %c0_2] : memref<1x512xf32, #tpu.memory_space<vmem>>, vector<1x512xf32>
    %2 = vector.broadcast %1 : vector<1x512xf32> to vector<2x512xf32>
    %3 = arith.divf %0, %2 : vector<2x512xf32>
    %4 = math.roundeven %3 : vector<2x512xf32>
    %c0_3 = arith.constant 0 : index
    %c0_4 = arith.constant 0 : index
    %5 = vector.load %arg3[%c0_3, %c0_4] : memref<2x512xf32, #tpu.memory_space<vmem>>, vector<2x512xf32>
    tpu.vector_store %arg3[%c0_3, %c0_4], %4 {strides = array<i32>} : memref<2x512xf32, #tpu.memory_space<vmem>>, vector<2x512xf32>,
    return
  }
  func.func @transform_0(%arg0: i32) -> (i32, i32) {
    %c0_i32 = arith.constant 0 : i32
    %c0_i32_0 = arith.constant 0 : i32
    return %arg0, %c0_i32 : i32, i32
  }
  func.func @transform_1(%arg0: i32) -> (i32, i32) {
    %c0_i32 = arith.constant 0 : i32
    %c0_i32_0 = arith.constant 0 : i32
    %c0_i32_1 = arith.constant 0 : i32
    return %c0_i32, %c0_i32_0 : i32, i32
  }
  func.func @transform_2(%arg0: i32) -> (i32, i32) {
    %c0_i32 = arith.constant 0 : i32
    %c0_i32_0 = arith.constant 0 : i32
    return %arg0, %c0_i32 : i32, i32
  }
}

</mosaic_0001>

<bundles_post_ra>
// kernel: tpu_custom_call.1
= control target key start
LH: loop header
LB: loop body
LE: loop exit
PB: predicated region body
PF: predicated region fallthrough
CT: control target
= control target key end

     0   :  { %7 = vsyncpa [#allocation3], 0  ;;  %s227_s0 = inlined_call_operand.hbm [shape: f32[2,512], index: 0, kind: input, shape index: {}]   ;;  %s228_s1 = inlined_call_operand.hbm [shape: f32[1,512], index: 1, kind: input, shape index: {}]   ;;  %s229_s2 = inlined_call_operand.hbm [shape: f32[2,512], index: 2, kind: output, shape index: {}]  }
   0x1   :  { %8 = vsyncpa [#allocation6], 0 }
   0x2   :  { %9 = vsyncpa [#allocation4], 0  ;;  %s172_s9 = smov [#allocation2]   ;;  %s173_s11 = smov [#allocation5]  }
   0x3   :  { %s16_s10 = sshll.u32 %s172_s9, 4  ;;  %s26_s12 = sshll.u32 %s173_s11, 4  ;;  %s17_s10 = int_to_ptr.vmem [resolvable:$true] %s16_s10  ;;  %s27_s12 = int_to_ptr.vmem [resolvable:$true] %s26_s12 }
   0x4   :  { %s100_s15 = scalar_lea.hbm %s227_s0, 128 }
   0x5   :  { %p101_p0 = scmp.ne.s32.totalorder %s227_s0, %s100_s15  ;;  %p104_p1 = scmp.lt.u32.totalorder %s100_s15, %s227_s0 }
   0x7   :  { %p106_p2 = pnand %p104_p1, %p101_p0 }
   0x9   :  { %109 = shalt.err (!%p106_p2)
}
   0xa   :  { %s110_s20 = scalar_lea.vmem %s17_s10, 128  ;;  %p115_p4 = scmp.lt.s32.totalorder %s17_s10, %s17_s10 }
   0xb   :  { %p111_p3 = scmp.ne.s32.totalorder %s17_s10, %s110_s20  ;;  %p116_p5 = scmp.lt.s32.totalorder %s110_s20, %s110_s20 }
   0xd   :  { %p117_p6 = por %p116_p5, %p115_p4 }
   0xf   :  { %p118_p7 = pnand %p117_p6, %p111_p3 }
  0x11   :  { %121 = shalt.err (!%p118_p7)
}
  0x12   :  { %19 = dma.hbm_to_vmem [thread:$0]  %s227_s0, 128, %s17_s10, [#allocation3]  }
  0x13   :  { %s122_s25 = scalar_lea.hbm %s228_s1, 64 }
  0x14   :  { %p123_p8 = scmp.ne.s32.totalorder %s228_s1, %s122_s25  ;;  %p126_p9 = scmp.lt.u32.totalorder %s122_s25, %s228_s1 }
  0x16   :  { %p128_p10 = pnand %p126_p9, %p123_p8 }
  0x18   :  { %131 = shalt.err (!%p128_p10)
}
  0x19   :  { %s132_s30 = scalar_lea.vmem %s27_s12, 64  ;;  %p137_p12 = scmp.lt.s32.totalorder %s27_s12, %s27_s12 }
  0x1a   :  { %p133_p11 = scmp.ne.s32.totalorder %s27_s12, %s132_s30  ;;  %p138_p13 = scmp.lt.s32.totalorder %s132_s30, %s132_s30 }
  0x1c   :  { %p139_p0 = por %p138_p13, %p137_p12 }
  0x1e   :  { %p140_p1 = pnand %p139_p0, %p133_p11 }
  0x20   :  { %143 = shalt.err (!%p140_p1)
}
  0x21   :  { %29 = dma.hbm_to_vmem [thread:$0]  %s228_s1, 64, %s27_s12, [#allocation6]  }
  0x22   :  { %166 = dma.done.wait [#allocation3], 128  }
  0x23   :  { %167 = vsyncadd [#allocation3], 4294967168 }
  0x24   :  { %168 = dma.done.wait [#allocation6], 64  }
  0x25   :  { %169 = vsyncadd [#allocation6], 4294967232  ;;  %v39_v0 = vlaneseq  ;;  %v174_v1 = vmov 1983009808   ;;  %v37_v9 = vld [vmem:[#allocation5] sm:$0xf] }
  0x26   :  { %v58_v2 = vunpack.c.l.s4 %v174_v1  ;;  %v36_v20 = vld [vmem:[#allocation2] sm:$0xff]  ;;  %s175_s1 = smov [#allocation7]  }
  0x27   :  { %v40_v3 = vshrl.u32 %v39_v0, 7  ;;  %s83_s4 = sshll.u32 %s175_s1, 4  ;;  %s84_s4 = int_to_ptr.vmem [resolvable:$true] %s83_s4 }
  0x28   :  { %v59_v4 = vunpack.c.0.s8 %v58_v2  ;;  %s144_s5 = scalar_lea.vmem %s84_s4, 128  ;;  %p149_p3 = scmp.lt.s32.totalorder %s84_s4, %s84_s4 }
  0x29   :  { %v41_v5 = vsub.s32 0, %v40_v3  ;;  %v45_v6 = vsub.s32 1, %v40_v3  ;;  %v49_v7 = vsub.s32 2, %v40_v3  ;;  %v53_v8 = vsub.s32 3, %v40_v3  ;;  %p145_p2 = scmp.ne.s32.totalorder %s84_s4, %s144_s5  ;;  %p150_p4 = scmp.lt.s32.totalorder %s144_s5, %s144_s5 }
  0x2a   :  { %v62_v10 = vsub.s32 %v59_v4, %v40_v3 }
  0x2b   :  { %v42_v11 = vrot.slane %v37_v9, %v41_v5  ;;  %v46_v12 = vrot.slane %v37_v9, %v45_v6  ;;  %v50_v13 = vrot.slane %v37_v9, %v49_v7  ;;  %v54_v14 = vrot.slane %v37_v9, %v53_v8  ;;  %p151_p5 = por %p150_p4, %p149_p3 }
  0x2d   :  { %v55_v15 = vcombine.low %v42_v11, %v46_v12  ;;  %v56_v16 = vcombine.low %v50_v13, %v54_v14  ;;  %p152_p6 = pnand %p151_p5, %p145_p2 }
  0x2f   :  { %v63_v17 = vrot.slane %v55_v15, %v62_v10  ;;  %v70_v18 = vrot.slane %v56_v16, %v62_v10 }
  0x31   :  { %v71_v19 = vcombine.low %v63_v17, %v70_v18 }
  0x33   :  { %98 = vrcp.f32 %v71_v19 }
  0x3d   :  { %v99_v21 = vpop.eup %98 }
  0x3e   :  { %v74_v22 = vmul.f32 %v99_v21, %v36_v20 }
  0x40   :  { %v93_v23 = vround.rtne.f32 %v74_v22 }
  0x42   :  { %76 = vst [vmem:[#allocation7] sm:$0xff] %v93_v23 }
  0x43   :  { %155 = shalt.err (!%p152_p6)
}
  0x44   :  { %s156_s8 = scalar_lea.hbm %s229_s2, 128 }
  0x45   :  { %p157_p7 = scmp.ne.s32.totalorder %s229_s2, %s156_s8  ;;  %p160_p8 = scmp.lt.u32.totalorder %s156_s8, %s229_s2 }
  0x47   :  { %p162_p9 = pnand %p160_p8, %p157_p7 }
  0x49   :  { %165 = shalt.err (!%p162_p9)
}
  0x4a   :  { %86 = dma.vmem_to_hbm [thread:$0]  %s84_s4, 128, %s229_s2, [#allocation4]  }
  0x4b   :  { %170 = dma.done.wait [#allocation4], 128  }
  0x4c   :  { %171 = vsyncadd [#allocation4], 4294967168 }
  0x4d   :  { %90 = vsyncpa [#allocation3], 1 }
  0x4e   :  { %91 = vsyncpa [#allocation6], 1 }
  0x4f   :  { %92 = vsyncpa [#allocation4], 1 }

</bundles_post_ra>
